<compile_context>
chip_gen: v7x
topology: tpu7x:2x2x1
jax: 0.10.0
libtpu: 0.0.40
codegen_flags: <defaults>
</compile_context>

<pallas_src>
import jax
import jax.numpy as jnp
from jax.experimental import pallas as pl
from jax.experimental.pallas import tpu as pltpu


def _round_up(x, m):
    return ((x + m - 1) // m) * m


# ----------------------------------------------------------------------------
# Pallas kernel: one decode step per grid iteration; weights stay VMEM-resident
# and the hidden state is carried in VMEM scratch across the whole grid.
# ----------------------------------------------------------------------------
def decoder_kernel(
    ids_ref,      # SMEM [T, BP] int32  (scalar-prefetched token ids)
    emb_tab_ref,  # VMEM [V, E]         (resident embedding table)
    hid0_ref,     # VMEM [BP, D]        (initial hidden state)
    enc_ref,      # VMEM [BP, S, H2]    (resident, batch-major encoder outputs)
    eproj_ref,    # VMEM [BP, S, D]     (resident, enc @ wa_e + b_a)
    sbias_ref,    # VMEM [BP, S]        (resident, 0 keep / -1e10 masked)
    wh_ref,       # VMEM [D, 4D]        ([whr | whz | whn | wa_h])
    wx_ref,       # VMEM [E+H2, 3D+E]   ([we ; ww] stacked along the input dim)
    wo_ref,       # VMEM [D, E]         (fc_out weight on the hidden segment)
    consts_ref,   # VMEM [1, 5D+E]      ([v_a | b_r | b_z | b_in | b_out | b_hn])
    out_ref,      # VMEM [BP, TOT_PAD]  packed [pred | h_new | attn | pad], per step
    h_scr,        # scratch VMEM [BP, D] hidden carried across grid steps
):
    BP, S, H2 = enc_ref.shape
    D = h_scr.shape[1]
    E = emb_tab_ref.shape[1]
    t = pl.program_id(0)

    @pl.when(t == 0)
    def _():
        h_scr[...] = hid0_ref[...]

    h = h_scr[...]                                                     # [BP, D]

    # ---- fused hidden-path matmul: GRU r/z/n hidden terms + attention query ----
    gh = jnp.dot(h.astype(wh_ref.dtype), wh_ref[...],
                 preferred_element_type=jnp.float32)                   # [BP, 4D]
    hproj = gh[:, 3 * D:]                                              # [BP, D]

    # ---- attention (keys eproj/b_a precomputed once per source sequence) ----
    v_a = consts_ref[:, :D]                                            # [1, D]
    energy = jnp.tanh(hproj[:, None, :] + eproj_ref[...])              # [BP, S, D]
    scores = jnp.sum(energy * v_a[None], axis=-1) + sbias_ref[...]     # [BP, S]
    m = jnp.max(scores, axis=-1, keepdims=True)
    e = jnp.exp(scores - m)
    denom = jnp.sum(e, axis=-1, keepdims=True)
    inv = pl.reciprocal(denom, approx=True)        # EUP slot (free here)
    inv = inv * (2.0 - denom * inv)                # one Newton step -> full precision
    a = e * inv                                                        # [BP, S]

    # ---- context: VPU broadcast-multiply + reduce (S small; keep MXU free) ----
    weighted = jnp.sum(a[:, :, None] * enc_ref[...], axis=1)           # [BP, H2]

    # ---- embedding gather from the VMEM-resident table (dynamic row slices) ----
    emb = jnp.concatenate(
        [emb_tab_ref[pl.ds(ids_ref[t, b], 1), :] for b in range(BP)], axis=0)  # [BP, E]

    # ---- merged input-path matmul: [emb | weighted] @ [[we];[ww]] ----
    x = jnp.concatenate([emb, weighted], axis=1)                       # [BP, E+H2]
    bx = consts_ref[:, D:4 * D + E]                                    # [1, 3D+E]
    bhn = consts_ref[:, 4 * D + E:5 * D + E]                           # [1, D]
    s = jnp.dot(x.astype(wx_ref.dtype), wx_ref[...],
                preferred_element_type=jnp.float32) + bx               # [BP, 3D+E]

    # ---- single-step GRU (f32 activations / state) ----
    r = jax.nn.sigmoid(s[:, :D] + gh[:, :D])
    z = jax.nn.sigmoid(s[:, D:2 * D] + gh[:, D:2 * D])
    n = jnp.tanh(s[:, 2 * D:3 * D] + r * (gh[:, 2 * D:3 * D] + bhn))
    h_new = (1.0 - z) * n + z * h                                      # [BP, D]
    h_scr[...] = h_new

    # ---- output projection: fc_out([h_new ; weighted ; embedded]) ----
    pred = (jnp.dot(h_new.astype(wo_ref.dtype), wo_ref[...],
                    preferred_element_type=jnp.float32) + s[:, 3 * D:])  # [BP, E]

    # ---- single lane-dense packed store ----
    pieces = [pred, h_new, a]
    pad = out_ref.shape[1] - (E + D + S)
    if pad > 0:
        pieces.append(jnp.zeros((BP, pad), jnp.float32))
    out_ref[...] = jnp.concatenate(pieces, axis=1)


# ----------------------------------------------------------------------------
# One-time parameter fusion (concat along output / input dims).
# ----------------------------------------------------------------------------
def fuse_params(p, mxu_dtype=jnp.float32):
    # TODO(synk): pass mxu_dtype=jnp.bfloat16 at production sizes (2x MXU, half
    # the VMEM weight residency); keep softmax/GRU activations in f32.
    we = jnp.concatenate([p["wir_e"], p["wiz_e"], p["win_e"], p["wout_e"]], axis=1)
    ww = jnp.concatenate([p["wir_w"], p["wiz_w"], p["win_w"], p["wout_w"]], axis=1)
    return dict(
        embedding=p["embedding"],
        wa_e=p["wa_e"], b_a=p["b_a"],
        wh=jnp.concatenate([p["whr"], p["whz"], p["whn"], p["wa_h"]],
                           axis=1).astype(mxu_dtype),                  # [D, 4D]
        wx=jnp.concatenate([we, ww], axis=0).astype(mxu_dtype),        # [E+H2, 3D+E]
        wo=p["wout_o"].astype(mxu_dtype),                              # [D, E]
        consts=jnp.concatenate([p["v_a"], p["b_r"], p["b_z"], p["b_in"],
                                p["b_out"], p["b_hn"]], axis=1),       # [1, 5D+E]
    )


# ----------------------------------------------------------------------------
# Per-source-sequence precompute (hoisted out of the decode grid entirely).
# ----------------------------------------------------------------------------
def precompute_encoder(fused, encoder_outputs, mask):
    enc_b = jnp.transpose(encoder_outputs, (1, 0, 2))                        # [B, S, H2]
    eproj = jnp.einsum("bsh,hd->bsd", enc_b, fused["wa_e"]) + fused["b_a"]   # [B, S, D]
    sbias = jnp.where(mask > 0, 0.0, -1e10).astype(jnp.float32)              # [B, S]
    return enc_b, eproj, sbias


# ----------------------------------------------------------------------------
# Fused T-step teacher-forced decode: ONE pallas_call, grid over decode steps.
# ----------------------------------------------------------------------------
def decoder_decode(fused, ids_TB, hidden0, encoder_outputs, mask):
    enc_b, eproj, sbias = precompute_encoder(fused, encoder_outputs, mask)
    T, B = ids_TB.shape
    S = enc_b.shape[1]
    D = hidden0.shape[1]
    E = fused["embedding"].shape[1]

    BP = max(8, _round_up(B, 8))                 # fill f32 sublanes
    TOT = E + D + S
    TOT_PAD = _round_up(TOT, 128)                # lane-dense packed output slab

    def padb(x):
        return jnp.pad(x, [(0, BP - B)] + [(0, 0)] * (x.ndim - 1))

    ids_p = jnp.pad(ids_TB.astype(jnp.int32), ((0, 0), (0, BP - B)))
    hid_p, enc_p, eproj_p, sbias_p = map(padb, (hidden0, enc_b, eproj, sbias))

    vmem = lambda: pl.BlockSpec(memory_space=pltpu.MemorySpace.VMEM)
    grid_spec = pltpu.PrefetchScalarGridSpec(
        num_scalar_prefetch=1,
        grid=(T,),
        in_specs=[vmem() for _ in range(9)],     # whole-array, resident across T
        out_specs=pl.BlockSpec((None, BP, TOT_PAD), lambda t, ids: (t, 0, 0)),
        scratch_shapes=[pltpu.VMEM((BP, D), jnp.float32)],
    )

    out = pl.pallas_call(
        decoder_kernel,
        out_shape=jax.ShapeDtypeStruct((T, BP, TOT_PAD), jnp.float32),
        grid_spec=grid_spec,
        compiler_params=pltpu.CompilerParams(
            dimension_semantics=("arbitrary",)),  # hidden carries across steps
    )(ids_p, fused["embedding"], hid_p, enc_p, eproj_p, sbias_p,
      fused["wh"], fused["wx"], fused["wo"], fused["consts"])

    pred = out[:, :B, :E]
    h = out[:, :B, E:E + D]
    attn = out[:, :B, E + D:E + D + S]
    return pred, h, attn


def decoder_forward(fused, input_ids, hidden, encoder_outputs, mask):
    """Single decode step — matches the PyTorch Decoder.forward signature."""
    pred, h, attn = decoder_decode(fused, input_ids[None, :], hidden,
                                   encoder_outputs, mask)
    return pred[0], h[0], attn[0]


# ----------------------------------------------------------------------------
# Pure-JAX reference (unfused weights) for correctness checking.
# ----------------------------------------------------------------------------
def decoder_ref(params, input_ids, hidden, encoder_outputs, mask):
    emb = params["embedding"][input_ids]
    enc_b = jnp.transpose(encoder_outputs, (1, 0, 2))
    hproj = hidden @ params["wa_h"]
    eproj = jnp.einsum("bsh,hd->bsd", enc_b, params["wa_e"])
    energy = jnp.tanh(hproj[:, None, :] + eproj + params["b_a"])
    scores = jnp.sum(energy * params["v_a"], axis=-1)
    scores = jnp.where(mask == 0, -1e10, scores)
    a = jax.nn.softmax(scores, axis=1)
    weighted = jnp.einsum("bs,bsh->bh", a, enc_b)
    r = jax.nn.sigmoid(emb @ params["wir_e"] + weighted @ params["wir_w"]
                       + hidden @ params["whr"] + params["b_r"])
    z = jax.nn.sigmoid(emb @ params["wiz_e"] + weighted @ params["wiz_w"]
                       + hidden @ params["whz"] + params["b_z"])
    n = jnp.tanh(emb @ params["win_e"] + weighted @ params["win_w"] + params["b_in"]
                 + r * (hidden @ params["whn"] + params["b_hn"]))
    h_new = (1.0 - z) * n + z * hidden
    pred = (h_new @ params["wout_o"] + weighted @ params["wout_w"]
            + emb @ params["wout_e"] + params["b_out"])
    return pred, h_new, a


# ----------------------------------------------------------------------------
# Deterministic parameter init (shapes implied by Decoder.__init__; fc_out
# projects to emb_dim per the spec).
# ----------------------------------------------------------------------------
def init_params(key, output_dim, emb_dim, enc_hid_dim, dec_hid_dim):
    E, D, H2 = emb_dim, dec_hid_dim, 2 * enc_hid_dim
    keys = iter(jax.random.split(key, 32))

    def u(shape, scale=0.1):
        return jax.random.uniform(next(keys), shape, jnp.float32, -scale, scale)

    return dict(
        embedding=u((output_dim, E), 0.5),
        wa_h=u((D, D)), wa_e=u((H2, D)), b_a=u((1, D)), v_a=u((1, D)),
        wir_e=u((E, D)), wir_w=u((H2, D)), whr=u((D, D)),
        wiz_e=u((E, D)), wiz_w=u((H2, D)), whz=u((D, D)),
        win_e=u((E, D)), win_w=u((H2, D)), whn=u((D, D)),
        b_r=u((1, D)), b_z=u((1, D)), b_in=u((1, D)), b_hn=u((1, D)),
        wout_o=u((D, E)), wout_w=u((H2, E)), wout_e=u((E, E)), b_out=u((1, E)),
    )


if __name__ == "__main__":
    OUTPUT_DIM, EMB_DIM, ENC_HID, DEC_HID = 50, 32, 16, 32
    B, S, T = 4, 8, 5

    key = jax.random.PRNGKey(0)
    kp, ki, kh, ke = jax.random.split(key, 4)

    params = init_params(kp, OUTPUT_DIM, EMB_DIM, ENC_HID, DEC_HID)
    ids_TB = jax.random.randint(ki, (T, B), 0, OUTPUT_DIM)                    # [T, B]
    hidden = jax.random.normal(kh, (B, DEC_HID), jnp.float32)                 # [B, D]
    encoder_outputs = jax.random.normal(ke, (S, B, 2 * ENC_HID), jnp.float32) # [S, B, H2]
    valid_lens = jnp.array([8, 7, 6, 5], dtype=jnp.int32)
    mask = (jnp.arange(S)[None, :] < valid_lens[:, None]).astype(jnp.float32) # [B, S]

    fused = fuse_params(params)

    # --- single decode step (matches Decoder.forward exactly) ---
    pred1, h1, a1 = decoder_forward(fused, ids_TB[0], hidden, encoder_outputs, mask)
    jax.block_until_ready((pred1, h1, a1))
    pred1_r, h1_r, a1_r = decoder_ref(params, ids_TB[0], hidden, encoder_outputs, mask)
    assert pred1.shape == (B, EMB_DIM)
    assert h1.shape == (B, DEC_HID)
    assert a1.shape == (B, S)
    assert jnp.allclose(pred1, pred1_r, atol=1e-4, rtol=1e-4)
    assert jnp.allclose(h1, h1_r, atol=1e-4, rtol=1e-4)
    assert jnp.allclose(a1, a1_r, atol=1e-4, rtol=1e-4)

    # --- fused T-step teacher-forced decode (one pallas_call, resident weights) ---
    preds, hs, attns = decoder_decode(fused, ids_TB, hidden, encoder_outputs, mask)
    jax.block_until_ready((preds, hs, attns))

    h = hidden
    preds_r, hs_r, attns_r = [], [], []
    for t in range(T):
        p_r, h, a_r = decoder_ref(params, ids_TB[t], h, encoder_outputs, mask)
        preds_r.append(p_r); hs_r.append(h); attns_r.append(a_r)
    preds_r, hs_r, attns_r = jnp.stack(preds_r), jnp.stack(hs_r), jnp.stack(attns_r)

    assert jnp.allclose(preds, preds_r, atol=1e-3, rtol=1e-3)
    assert jnp.allclose(hs, hs_r, atol=1e-3, rtol=1e-3)
    assert jnp.allclose(attns, attns_r, atol=1e-3, rtol=1e-3)

    print("KERNEL_OK")
</pallas_src>

<mosaic_0001>
module attributes {stable_mosaic.version = 11 : i64} {
  func.func @decoder_kernel(%arg0: i32, %arg1: memref<1x8xi32, #tpu.memory_space<smem>>, %arg2: memref<50x32xf32, #tpu.memory_space<vmem>>, %arg3: memref<8x32xf32, #tpu.memory_space<vmem>>, %arg4: memref<8x8x32xf32, #tpu.memory_space<vmem>>, %arg5: memref<8x8x32xf32, #tpu.memory_space<vmem>>, %arg6: memref<8x8xf32, #tpu.memory_space<vmem>>, %arg7: memref<32x128xf32, #tpu.memory_space<vmem>>, %arg8: memref<64x128xf32, #tpu.memory_space<vmem>>, %arg9: memref<32x32xf32, #tpu.memory_space<vmem>>, %arg10: memref<1x192xf32, #tpu.memory_space<vmem>>, %arg11: memref<1x8x128xf32, #tpu.memory_space<vmem>>, %arg12: memref<8x32xf32, #tpu.memory_space<vmem>>) attributes {dimension_semantics = [#tpu.dimension_semantics<arbitrary>], iteration_bounds = array<i64: 1>, scalar_prefetch = 1 : i64, scratch_operands = 1 : i64, tpu.core_type = #tpu.core_type<tc>, window_params = [{pipeline_mode = #tpu.pipeline_mode<synchronous>, transform_indices = @transform_0, window_bounds = array<i64: 50, 32>}, {pipeline_mode = #tpu.pipeline_mode<synchronous>, transform_indices = @transform_1, window_bounds = array<i64: 8, 32>}, {pipeline_mode = #tpu.pipeline_mode<synchronous>, transform_indices = @transform_2, window_bounds = array<i64: 8, 8, 32>}, {pipeline_mode = #tpu.pipeline_mode<synchronous>, transform_indices = @transform_3, window_bounds = array<i64: 8, 8, 32>}, {pipeline_mode = #tpu.pipeline_mode<synchronous>, transform_indices = @transform_4, window_bounds = array<i64: 8, 8>}, {pipeline_mode = #tpu.pipeline_mode<synchronous>, transform_indices = @transform_5, window_bounds = array<i64: 32, 128>}, {pipeline_mode = #tpu.pipeline_mode<synchronous>, transform_indices = @transform_6, window_bounds = array<i64: 64, 128>}, {pipeline_mode = #tpu.pipeline_mode<synchronous>, transform_indices = @transform_7, window_bounds = array<i64: 32, 32>}, {pipeline_mode = #tpu.pipeline_mode<synchronous>, transform_indices = @transform_8, window_bounds = array<i64: 1, 192>}, {transform_indices = @transform_9, window_bounds = array<i64: 1, 8, 128>}]} {
    %c0_i32 = arith.constant 0 : i32
    %0 = arith.cmpi eq, %arg0, %c0_i32 : i32
    %1 = arith.extui %0 : i1 to i32
    %c0_i32_0 = arith.constant 0 : i32
    %2 = arith.cmpi ne, %1, %c0_i32_0 : i32
    scf.if %2 {
      %c0_45 = arith.constant 0 : index
      %c0_46 = arith.constant 0 : index
      %116 = vector.load %arg3[%c0_45, %c0_46] : memref<8x32xf32, #tpu.memory_space<vmem>>, vector<8x32xf32>
      %c0_47 = arith.constant 0 : index
      %c0_48 = arith.constant 0 : index
      %117 = vector.load %arg12[%c0_47, %c0_48] : memref<8x32xf32, #tpu.memory_space<vmem>>, vector<8x32xf32>
      tpu.vector_store %arg12[%c0_47, %c0_48], %116 {strides = array<i32>} : memref<8x32xf32, #tpu.memory_space<vmem>>, vector<8x32xf32>,
    } else {
    }
    %c0 = arith.constant 0 : index
    %c0_1 = arith.constant 0 : index
    %3 = vector.load %arg12[%c0, %c0_1] : memref<8x32xf32, #tpu.memory_space<vmem>>, vector<8x32xf32>
    %c0_2 = arith.constant 0 : index
    %c0_3 = arith.constant 0 : index
    %4 = vector.load %arg7[%c0_2, %c0_3] : memref<32x128xf32, #tpu.memory_space<vmem>>, vector<32x128xf32>
    %cst = arith.constant dense<0.000000e+00> : vector<8x128xf32>
    %5 = tpu.matmul %3, %4, %cst {dimension_numbers = #tpu.dot_dimension_numbers<[1], [0], [0], [1], [0, 0, 1, 1], [], []>} : vector<8x32xf32>, vector<32x128xf32>, vector<8x128xf32> -> vector<8x128xf32>
    %6 = vector.extract_strided_slice %5 {offsets = [0, 96], sizes = [8, 32], strides = [1, 1]} : vector<8x128xf32> to vector<8x32xf32>
    %c0_4 = arith.constant 0 : index
    %c0_5 = arith.constant 0 : index
    %7 = vector.load %arg10[%c0_4, %c0_5] : memref<1x192xf32, #tpu.memory_space<vmem>>, vector<1x32xf32>
    %8 = vector.shape_cast %6 : vector<8x32xf32> to vector<8x1x32xf32>
    %c0_6 = arith.constant 0 : index
    %c0_7 = arith.constant 0 : index
    %c0_8 = arith.constant 0 : index
    %9 = vector.load %arg5[%c0_6, %c0_7, %c0_8] : memref<8x8x32xf32, #tpu.memory_space<vmem>>, vector<8x8x32xf32>
    %10 = vector.broadcast %8 : vector<8x1x32xf32> to vector<8x8x32xf32>
    %11 = arith.addf %10, %9 : vector<8x8x32xf32>
    %12 = math.tanh %11 : vector<8x8x32xf32>
    %13 = vector.shape_cast %7 : vector<1x32xf32> to vector<1x1x32xf32>
    %14 = vector.broadcast %13 : vector<1x1x32xf32> to vector<8x8x32xf32>
    %15 = arith.mulf %12, %14 : vector<8x8x32xf32>
    %cst_9 = arith.constant dense<0.000000e+00> : vector<8x8xf32>
    %16 = vector.multi_reduction <add>, %15, %cst_9 [2] : vector<8x8x32xf32> to vector<8x8xf32>
    %c0_10 = arith.constant 0 : index
    %c0_11 = arith.constant 0 : index
    %17 = vector.load %arg6[%c0_10, %c0_11] : memref<8x8xf32, #tpu.memory_space<vmem>>, vector<8x8xf32>
    %18 = arith.addf %16, %17 : vector<8x8xf32>
    %cst_12 = arith.constant dense<0xFF800000> : vector<8xf32>
    %19 = vector.multi_reduction <maximumf>, %18, %cst_12 [1] : vector<8x8xf32> to vector<8xf32>
    %20 = vector.shape_cast %19 : vector<8xf32> to vector<8x1xf32>
    %21 = vector.broadcast %20 : vector<8x1xf32> to vector<8x8xf32>
    %22 = arith.subf %18, %21 : vector<8x8xf32>
    %23 = math.exp %22 : vector<8x8xf32>
    %cst_13 = arith.constant dense<0.000000e+00> : vector<8xf32>
    %24 = vector.multi_reduction <add>, %23, %cst_13 [1] : vector<8x8xf32> to vector<8xf32>
    %25 = vector.shape_cast %24 : vector<8xf32> to vector<8x1xf32>
    %26 = tpu.reciprocal %25 {approx = true} : vector<8x1xf32> -> vector<8x1xf32>
    %27 = arith.mulf %25, %26 : vector<8x1xf32>
    %cst_14 = arith.constant 2.000000e+00 : f32
    %28 = vector.broadcast %cst_14 : f32 to vector<8x1xf32>
    %29 = arith.subf %28, %27 : vector<8x1xf32>
    %30 = arith.mulf %26, %29 : vector<8x1xf32>
    %31 = vector.broadcast %30 : vector<8x1xf32> to vector<8x8xf32>
    %32 = arith.mulf %23, %31 : vector<8x8xf32>
    %33 = vector.shape_cast %32 : vector<8x8xf32> to vector<8x8x1xf32>
    %c0_15 = arith.constant 0 : index
    %c0_16 = arith.constant 0 : index
    %c0_17 = arith.constant 0 : index
    %34 = vector.load %arg4[%c0_15, %c0_16, %c0_17] : memref<8x8x32xf32, #tpu.memory_space<vmem>>, vector<8x8x32xf32>
    %35 = vector.broadcast %33 : vector<8x8x1xf32> to vector<8x8x32xf32>
    %36 = arith.mulf %35, %34 : vector<8x8x32xf32>
    %cst_18 = arith.constant dense<0.000000e+00> : vector<8x32xf32>
    %37 = vector.multi_reduction <add>, %36, %cst_18 [1] : vector<8x8x32xf32> to vector<8x32xf32>
    %38 = arith.index_cast %arg0 : i32 to index
    %c0_19 = arith.constant 0 : index
    %39 = memref.load %arg1[%38, %c0_19] : memref<1x8xi32, #tpu.memory_space<smem>>
    %40 = arith.index_cast %39 : i32 to index
    %c0_20 = arith.constant 0 : index
    %41 = vector.load %arg2[%40, %c0_20] : memref<50x32xf32, #tpu.memory_space<vmem>>, vector<1x32xf32>
    %42 = arith.index_cast %arg0 : i32 to index
    %c1 = arith.constant 1 : index
    %43 = memref.load %arg1[%42, %c1] : memref<1x8xi32, #tpu.memory_space<smem>>
    %44 = arith.index_cast %43 : i32 to index
    %c0_21 = arith.constant 0 : index
    %45 = vector.load %arg2[%44, %c0_21] : memref<50x32xf32, #tpu.memory_space<vmem>>, vector<1x32xf32>
    %46 = arith.index_cast %arg0 : i32 to index
    %c2 = arith.constant 2 : index
    %47 = memref.load %arg1[%46, %c2] : memref<1x8xi32, #tpu.memory_space<smem>>
    %48 = arith.index_cast %47 : i32 to index
    %c0_22 = arith.constant 0 : index
    %49 = vector.load %arg2[%48, %c0_22] : memref<50x32xf32, #tpu.memory_space<vmem>>, vector<1x32xf32>
    %50 = arith.index_cast %arg0 : i32 to index
    %c3 = arith.constant 3 : index
    %51 = memref.load %arg1[%50, %c3] : memref<1x8xi32, #tpu.memory_space<smem>>
    %52 = arith.index_cast %51 : i32 to index
    %c0_23 = arith.constant 0 : index
    %53 = vector.load %arg2[%52, %c0_23] : memref<50x32xf32, #tpu.memory_space<vmem>>, vector<1x32xf32>
    %54 = arith.index_cast %arg0 : i32 to index
    %c4 = arith.constant 4 : index
    %55 = memref.load %arg1[%54, %c4] : memref<1x8xi32, #tpu.memory_space<smem>>
    %56 = arith.index_cast %55 : i32 to index
    %c0_24 = arith.constant 0 : index
    %57 = vector.load %arg2[%56, %c0_24] : memref<50x32xf32, #tpu.memory_space<vmem>>, vector<1x32xf32>
    %58 = arith.index_cast %arg0 : i32 to index
    %c5 = arith.constant 5 : index
    %59 = memref.load %arg1[%58, %c5] : memref<1x8xi32, #tpu.memory_space<smem>>
    %60 = arith.index_cast %59 : i32 to index
    %c0_25 = arith.constant 0 : index
    %61 = vector.load %arg2[%60, %c0_25] : memref<50x32xf32, #tpu.memory_space<vmem>>, vector<1x32xf32>
    %62 = arith.index_cast %arg0 : i32 to index
    %c6 = arith.constant 6 : index
    %63 = memref.load %arg1[%62, %c6] : memref<1x8xi32, #tpu.memory_space<smem>>
    %64 = arith.index_cast %63 : i32 to index
    %c0_26 = arith.constant 0 : index
    %65 = vector.load %arg2[%64, %c0_26] : memref<50x32xf32, #tpu.memory_space<vmem>>, vector<1x32xf32>
    %66 = arith.index_cast %arg0 : i32 to index
    %c7 = arith.constant 7 : index
    %67 = memref.load %arg1[%66, %c7] : memref<1x8xi32, #tpu.memory_space<smem>>
    %68 = arith.index_cast %67 : i32 to index
    %c0_27 = arith.constant 0 : index
    %69 = vector.load %arg2[%68, %c0_27] : memref<50x32xf32, #tpu.memory_space<vmem>>, vector<1x32xf32>
    %70 = tpu.concatenate %41, %45, %49, %53, %57, %61, %65, %69 in 0 : vector<1x32xf32>, vector<1x32xf32>, vector<1x32xf32>, vector<1x32xf32>, vector<1x32xf32>, vector<1x32xf32>, vector<1x32xf32>, vector<1x32xf32> -> vector<8x32xf32>
    %71 = tpu.concatenate %70, %37 in 1 : vector<8x32xf32>, vector<8x32xf32> -> vector<8x64xf32>
    %c0_28 = arith.constant 0 : index
    %c32 = arith.constant 32 : index
    %72 = vector.load %arg10[%c0_28, %c32] : memref<1x192xf32, #tpu.memory_space<vmem>>, vector<1x128xf32>
    %c0_29 = arith.constant 0 : index
    %c160 = arith.constant 160 : index
    %73 = vector.load %arg10[%c0_29, %c160] : memref<1x192xf32, #tpu.memory_space<vmem>>, vector<1x32xf32>
    %c0_30 = arith.constant 0 : index
    %c0_31 = arith.constant 0 : index
    %74 = vector.load %arg8[%c0_30, %c0_31] : memref<64x128xf32, #tpu.memory_space<vmem>>, vector<64x128xf32>
    %cst_32 = arith.constant dense<0.000000e+00> : vector<8x128xf32>
    %75 = tpu.matmul %71, %74, %cst_32 {dimension_numbers = #tpu.dot_dimension_numbers<[1], [0], [0], [1], [0, 0, 1, 1], [], []>} : vector<8x64xf32>, vector<64x128xf32>, vector<8x128xf32> -> vector<8x128xf32>
    %76 = vector.broadcast %72 : vector<1x128xf32> to vector<8x128xf32>
    %77 = arith.addf %75, %76 : vector<8x128xf32>
    %78 = vector.extract_strided_slice %77 {offsets = [0, 0], sizes = [8, 32], strides = [1, 1]} : vector<8x128xf32> to vector<8x32xf32>
    %79 = vector.extract_strided_slice %5 {offsets = [0, 0], sizes = [8, 32], strides = [1, 1]} : vector<8x128xf32> to vector<8x32xf32>
    %80 = arith.addf %78, %79 : vector<8x32xf32>
    %81 = arith.negf %80 : vector<8x32xf32>
    %82 = math.exp %81 : vector<8x32xf32>
    %cst_33 = arith.constant 1.000000e+00 : f32
    %83 = vector.broadcast %cst_33 : f32 to vector<8x32xf32>
    %84 = arith.addf %83, %82 : vector<8x32xf32>
    %85 = arith.divf %83, %84 : vector<8x32xf32>
    %86 = vector.extract_strided_slice %77 {offsets = [0, 32], sizes = [8, 32], strides = [1, 1]} : vector<8x128xf32> to vector<8x32xf32>
    %87 = vector.extract_strided_slice %5 {offsets = [0, 32], sizes = [8, 32], strides = [1, 1]} : vector<8x128xf32> to vector<8x32xf32>
    %88 = arith.addf %86, %87 : vector<8x32xf32>
    %89 = arith.negf %88 : vector<8x32xf32>
    %90 = math.exp %89 : vector<8x32xf32>
    %cst_34 = arith.constant 1.000000e+00 : f32
    %91 = vector.broadcast %cst_34 : f32 to vector<8x32xf32>
    %92 = arith.addf %91, %90 : vector<8x32xf32>
    %93 = arith.divf %91, %92 : vector<8x32xf32>
    %94 = vector.extract_strided_slice %77 {offsets = [0, 64], sizes = [8, 32], strides = [1, 1]} : vector<8x128xf32> to vector<8x32xf32>
    %95 = vector.extract_strided_slice %5 {offsets = [0, 64], sizes = [8, 32], strides = [1, 1]} : vector<8x128xf32> to vector<8x32xf32>
    %96 = vector.broadcast %73 : vector<1x32xf32> to vector<8x32xf32>
    %97 = arith.addf %95, %96 : vector<8x32xf32>
    %98 = arith.mulf %85, %97 : vector<8x32xf32>
    %99 = arith.addf %94, %98 : vector<8x32xf32>
    %100 = math.tanh %99 : vector<8x32xf32>
    %cst_35 = arith.constant 1.000000e+00 : f32
    %101 = vector.broadcast %cst_35 : f32 to vector<8x32xf32>
    %102 = arith.subf %101, %93 : vector<8x32xf32>
    %103 = arith.mulf %102, %100 : vector<8x32xf32>
    %104 = arith.mulf %93, %3 : vector<8x32xf32>
    %105 = arith.addf %103, %104 : vector<8x32xf32>
    %c0_36 = arith.constant 0 : index
    %c0_37 = arith.constant 0 : index
    %106 = vector.load %arg12[%c0_36, %c0_37] : memref<8x32xf32, #tpu.memory_space<vmem>>, vector<8x32xf32>
    tpu.vector_store %arg12[%c0_36, %c0_37], %105 {strides = array<i32>} : memref<8x32xf32, #tpu.memory_space<vmem>>, vector<8x32xf32>,
    %c0_38 = arith.constant 0 : index
    %c0_39 = arith.constant 0 : index
    %107 = vector.load %arg9[%c0_38, %c0_39] : memref<32x32xf32, #tpu.memory_space<vmem>>, vector<32x32xf32>
    %cst_40 = arith.constant dense<0.000000e+00> : vector<8x32xf32>
    %108 = tpu.matmul %105, %107, %cst_40 {dimension_numbers = #tpu.dot_dimension_numbers<[1], [0], [0], [1], [0, 0, 1, 1], [], []>} : vector<8x32xf32>, vector<32x32xf32>, vector<8x32xf32> -> vector<8x32xf32>
    %109 = vector.extract_strided_slice %77 {offsets = [0, 96], sizes = [8, 32], strides = [1, 1]} : vector<8x128xf32> to vector<8x32xf32>
    %110 = arith.addf %108, %109 : vector<8x32xf32>
    %cst_41 = arith.constant 0.000000e+00 : f32
    %111 = vector.broadcast %cst_41 : f32 to vector<8x56xf32>
    %112 = tpu.concatenate %110, %105, %32, %111 in 1 : vector<8x32xf32>, vector<8x32xf32>, vector<8x8xf32>, vector<8x56xf32> -> vector<8x128xf32>
    %c0_42 = arith.constant 0 : index
    %c0_43 = arith.constant 0 : index
    %c0_44 = arith.constant 0 : index
    %113 = vector.load %arg11[%c0_42, %c0_43, %c0_44] : memref<1x8x128xf32, #tpu.memory_space<vmem>>, vector<1x8x128xf32>
    %114 = vector.shape_cast %113 : vector<1x8x128xf32> to vector<8x128xf32>
    %115 = vector.shape_cast %112 : vector<8x128xf32> to vector<1x8x128xf32>
    tpu.vector_store %arg11[%c0_42, %c0_43, %c0_44], %115 {strides = array<i32>} : memref<1x8x128xf32, #tpu.memory_space<vmem>>, vector<1x8x128xf32>,
    return
  }
  func.func @transform_0(%arg0: i32, %arg1: memref<1x8xi32, #tpu.memory_space<smem>>) -> (i32, i32) {
    %c0_i32 = arith.constant 0 : i32
    %c0_i32_0 = arith.constant 0 : i32
    %c0_i32_1 = arith.constant 0 : i32
    return %c0_i32, %c0_i32_0 : i32, i32
  }
  func.func @transform_1(%arg0: i32, %arg1: memref<1x8xi32, #tpu.memory_space<smem>>) -> (i32, i32) {
    %c0_i32 = arith.constant 0 : i32
    %c0_i32_0 = arith.constant 0 : i32
    %c0_i32_1 = arith.constant 0 : i32
    return %c0_i32, %c0_i32_0 : i32, i32
  }
  func.func @transform_2(%arg0: i32, %arg1: memref<1x8xi32, #tpu.memory_space<smem>>) -> (i32, i32, i32) {
    %c0_i32 = arith.constant 0 : i32
    %c0_i32_0 = arith.constant 0 : i32
    %c0_i32_1 = arith.constant 0 : i32
    %c0_i32_2 = arith.constant 0 : i32
    return %c0_i32, %c0_i32_0, %c0_i32_1 : i32, i32, i32
  }
  func.func @transform_3(%arg0: i32, %arg1: memref<1x8xi32, #tpu.memory_space<smem>>) -> (i32, i32, i32) {
    %c0_i32 = arith.constant 0 : i32
    %c0_i32_0 = arith.constant 0 : i32
    %c0_i32_1 = arith.constant 0 : i32
    %c0_i32_2 = arith.constant 0 : i32
    return %c0_i32, %c0_i32_0, %c0_i32_1 : i32, i32, i32
  }
  func.func @transform_4(%arg0: i32, %arg1: memref<1x8xi32, #tpu.memory_space<smem>>) -> (i32, i32) {
    %c0_i32 = arith.constant 0 : i32
    %c0_i32_0 = arith.constant 0 : i32
    %c0_i32_1 = arith.constant 0 : i32
    return %c0_i32, %c0_i32_0 : i32, i32
  }
  func.func @transform_5(%arg0: i32, %arg1: memref<1x8xi32, #tpu.memory_space<smem>>) -> (i32, i32) {
    %c0_i32 = arith.constant 0 : i32
    %c0_i32_0 = arith.constant 0 : i32
    %c0_i32_1 = arith.constant 0 : i32
    return %c0_i32, %c0_i32_0 : i32, i32
  }
  func.func @transform_6(%arg0: i32, %arg1: memref<1x8xi32, #tpu.memory_space<smem>>) -> (i32, i32) {
    %c0_i32 = arith.constant 0 : i32
    %c0_i32_0 = arith.constant 0 : i32
    %c0_i32_1 = arith.constant 0 : i32
    return %c0_i32, %c0_i32_0 : i32, i32
  }
  func.func @transform_7(%arg0: i32, %arg1: memref<1x8xi32, #tpu.memory_space<smem>>) -> (i32, i32) {
    %c0_i32 = arith.constant 0 : i32
    %c0_i32_0 = arith.constant 0 : i32
    %c0_i32_1 = arith.constant 0 : i32
    return %c0_i32, %c0_i32_0 : i32, i32
  }
  func.func @transform_8(%arg0: i32, %arg1: memref<1x8xi32, #tpu.memory_space<smem>>) -> (i32, i32) {
    %c0_i32 = arith.constant 0 : i32
    %c0_i32_0 = arith.constant 0 : i32
    %c0_i32_1 = arith.constant 0 : i32
    return %c0_i32, %c0_i32_0 : i32, i32
  }
  func.func @transform_9(%arg0: i32, %arg1: memref<1x8xi32, #tpu.memory_space<smem>>) -> (i32, i32, i32) {
    %c0_i32 = arith.constant 0 : i32
    %c0_i32_0 = arith.constant 0 : i32
    %c0_i32_1 = arith.constant 0 : i32
    return %arg0, %c0_i32, %c0_i32_0 : i32, i32, i32
  }
}

</mosaic_0001>

<bundles_post_ra>
// kernel: tpu_custom_call.1
= control target key start
LH: loop header
LB: loop body
LE: loop exit
PB: predicated region body
PF: predicated region fallthrough
CT: control target
= control target key end

     0   :  { %s1983_s0 = inlined_call_operand.hbm [shape: s32[1,8], index: 0, kind: input, shape index: {}]   ;;  %s1984_s1 = inlined_call_operand.vmem [shape: f32[50,32], index: 1, kind: input, shape index: {}]   ;;  %s1985_s2 = inlined_call_operand.hbm [shape: f32[8,32], index: 2, kind: input, shape index: {}]   ;;  %s1986_s3 = inlined_call_operand.vmem [shape: f32[8,8,32], index: 3, kind: input, shape index: {}]   ;;  %s1987_s4 = inlined_call_operand.hbm [shape: f32[8,8,32], index: 4, kind: input, shape index: {}]   ;;  %s1988_s5 = inlined_call_operand.vmem [shape: f32[8,8], index: 5, kind: input, shape index: {}]   ;;  %s1989_s6 = inlined_call_operand.vmem [shape: f32[32,128], index: 6, kind: input, shape index: {}]   ;;  %s1990_s7 = inlined_call_operand.hbm [shape: f32[64,128], index: 7, kind: input, shape index: {}]   ;;  %s1991_s8 = inlined_call_operand.hbm [shape: f32[32,32], index: 8, kind: input, shape index: {}]   ;;  %s1992_s9 = inlined_call_operand.vmem [shape: f32[1,192], index: 9, kind: input, shape index: {}]   ;;  %s1993_s10 = inlined_call_operand.hbm [shape: f32[1,8,128], index: 10, kind: output, shape index: {}]  }
   0x1   :  { %s1396_s15 = scalar_lea.hbm %s1983_s0, 16 }
   0x2   :  { %p1397_p0 = scmp.ne.s32.totalorder %s1983_s0, %s1396_s15  ;;  %p1400_p1 = scmp.lt.u32.totalorder %s1396_s15, %s1983_s0 }
   0x4   :  { %p1402_p2 = pnand %p1400_p1, %p1397_p0 }
   0x6   :  { %1405 = shalt.err (!%p1402_p2)  }
   0x7   :  { %s1526_s20 = smov [#allocation4]  }
   0x8   :  { %16 = dma.hbm_to_smem %s1983_s0, 16, %s1526_s20, [#allocation3] }
   0x9   :  { %1516 = dma.done.wait [#allocation3], 16 }
   0xa   :  { %1517 = vsyncadd [#allocation3], 4294967280 }
   0xb   :  { %18 = sfence }
   0xc   :  { %19 = vsyncpa [#allocation6], 0 }
   0xd   :  { %20 = vsyncpa [#allocation9], 0 }
   0xe   :  { %21 = vsyncpa [#allocation12], 0 }
   0xf   :  { %22 = vsyncpa [#allocation7], 0  ;;  %s1527_s23 = smov [#allocation8]   ;;  %s1406_s27 = scalar_lea.hbm %s1987_s4, 1024 }
  0x10   :  { %s42_s24 = sshll.u32 %s1527_s23, 4  ;;  %p1407_p3 = scmp.ne.s32.totalorder %s1987_s4, %s1406_s27  ;;  %s43_s24 = int_to_ptr.vmem [resolvable:$true] %s42_s24 }
  0x11   :  { %p1410_p4 = scmp.lt.u32.totalorder %s1406_s27, %s1987_s4 }
  0x13   :  { %p1412_p5 = pnand %p1410_p4, %p1407_p3 }
  0x15   :  { %1415 = shalt.err (!%p1412_p5)
}
  0x16   :  { %s1416_s11 = scalar_lea.vmem %s43_s24, 1024  ;;  %p1421_p7 = scmp.lt.s32.totalorder %s43_s24, %s43_s24 }
  0x17   :  { %p1417_p6 = scmp.ne.s32.totalorder %s43_s24, %s1416_s11  ;;  %p1422_p8 = scmp.lt.s32.totalorder %s1416_s11, %s1416_s11 }
  0x19   :  { %p1423_p9 = por %p1422_p8, %p1421_p7 }
  0x1b   :  { %p1424_p10 = pnand %p1423_p9, %p1417_p6 }
  0x1d   :  { %1427 = shalt.err (!%p1424_p10)
}
  0x1e   :  { %s1528_s12 = smov 128   ;;  %s1529_s13 = smov 8  }
  0x1f   :  { %48 = dma.hbm_to_vmem [thread:$0]  %s1987_s4, 1024, %s43_s24, [#allocation9], %s1528_s12, %s1528_s12, %s1529_s13  }
  0x20   :  { %s1530_s16 = smov [#allocation5]   ;;  %s1531_s18 = smov [#allocation10]  }
  0x21   :  { %s31_s17 = sshll.u32 %s1530_s16, 4  ;;  %s58_s19 = sshll.u32 %s1531_s18, 4  ;;  %s32_s17 = int_to_ptr.vmem [resolvable:$true] %s31_s17  ;;  %s59_s19 = int_to_ptr.vmem [resolvable:$true] %s58_s19 }
  0x22   :  { %s1428_s22 = scalar_lea.hbm %s1985_s2, 128 }
  0x23   :  { %p1429_p11 = scmp.ne.s32.totalorder %s1985_s2, %s1428_s22  ;;  %p1432_p12 = scmp.lt.u32.totalorder %s1428_s22, %s1985_s2 }
  0x25   :  { %p1434_p13 = pnand %p1432_p12, %p1429_p11 }
  0x27   :  { %1437 = shalt.err (!%p1434_p13)
}
  0x28   :  { %s1438_s4 = scalar_lea.vmem %s32_s17, 128  ;;  %p1443_p1 = scmp.lt.s32.totalorder %s32_s17, %s32_s17 }
  0x29   :  { %p1439_p0 = scmp.ne.s32.totalorder %s32_s17, %s1438_s4  ;;  %p1444_p2 = scmp.lt.s32.totalorder %s1438_s4, %s1438_s4 }
  0x2b   :  { %p1445_p3 = por %p1444_p2, %p1443_p1 }
  0x2d   :  { %p1446_p4 = pnand %p1445_p3, %p1439_p0 }
  0x2f   :  { %1449 = shalt.err (!%p1446_p4)
}
  0x30   :  { %34 = dma.hbm_to_vmem [thread:$0]  %s1985_s2, 128, %s32_s17, [#allocation6]  }
  0x31   :  { %s1450_s0 = scalar_lea.hbm %s1990_s7, 1024 }
  0x32   :  { %p1451_p5 = scmp.ne.s32.totalorder %s1990_s7, %s1450_s0  ;;  %p1454_p6 = scmp.lt.u32.totalorder %s1450_s0, %s1990_s7 }
  0x34   :  { %p1456_p7 = pnand %p1454_p6, %p1451_p5 }
  0x36   :  { %1459 = shalt.err (!%p1456_p7)
}
  0x37   :  { %s1460_s18 = scalar_lea.vmem %s59_s19, 1024  ;;  %p1465_p9 = scmp.lt.s32.totalorder %s59_s19, %s59_s19 }
  0x38   :  { %p1461_p8 = scmp.ne.s32.totalorder %s59_s19, %s1460_s18  ;;  %p1466_p10 = scmp.lt.s32.totalorder %s1460_s18, %s1460_s18 }
  0x3a   :  { %p1467_p11 = por %p1466_p10, %p1465_p9 }
  0x3c   :  { %p1468_p12 = pnand %p1467_p11, %p1461_p8 }
  0x3e   :  { %1471 = shalt.err (!%p1468_p12)
}
  0x3f   :  { %64 = dma.hbm_to_vmem [thread:$0]  %s1990_s7, 1024, %s59_s19, [#allocation9], %s1528_s12, %s1528_s12, %s1529_s13  }
  0x40   :  { %s1532_s20 = smov [#allocation11]   ;;  %s1472_s25 = scalar_lea.hbm %s1991_s8, 512 }
  0x41   :  { %s70_s21 = sshll.u32 %s1532_s20, 4  ;;  %p1473_p13 = scmp.ne.s32.totalorder %s1991_s8, %s1472_s25  ;;  %s71_s21 = int_to_ptr.vmem [resolvable:$true] %s70_s21 }
  0x42   :  { %p1476_p0 = scmp.lt.u32.totalorder %s1472_s25, %s1991_s8 }
  0x44   :  { %p1478_p1 = pnand %p1476_p0, %p1473_p13 }
  0x46   :  { %1481 = shalt.err (!%p1478_p1)
}
  0x47   :  { %s1482_s28 = scalar_lea.vmem %s71_s21, 512  ;;  %p1487_p3 = scmp.lt.s32.totalorder %s71_s21, %s71_s21 }
  0x48   :  { %p1483_p2 = scmp.ne.s32.totalorder %s71_s21, %s1482_s28  ;;  %p1488_p4 = scmp.lt.s32.totalorder %s1482_s28, %s1482_s28 }
  0x4a   :  { %p1489_p5 = por %p1488_p4, %p1487_p3 }
  0x4c   :  { %p1490_p6 = pnand %p1489_p5, %p1483_p2 }
  0x4e   :  { %1493 = shalt.err (!%p1490_p6)
}
  0x4f   :  { %76 = dma.hbm_to_vmem [thread:$0]  %s1991_s8, 512, %s71_s21, [#allocation12], %s1528_s12, %s1528_s12, %s1529_s13  }
  0x50   :  { %1518 = dma.done.wait [#allocation6], 128  }
  0x51   :  { %1519 = vsyncadd [#allocation6], 4294967168 }
  0x52   :  { %1520 = dma.done.wait [#allocation9], 2048  }
  0x53   :  { %1521 = vsyncadd [#allocation9], 4294965248 }
  0x54   :  { %1522 = dma.done.wait [#allocation12], 512  }
  0x55   :  { %1523 = vsyncadd [#allocation12], 4294966784  ;;  %v1533_v0 = vmov 0.0|0.0   ;;  %vm1534_vm0 = vmmov 0   ;;  %v1535_v1 = vmov 0.0   ;;  %vm96_vm1 = vcmask 261120  }
  0x56   :  { %1313 = vmatprep.subr.bf16.mxu0 %v1533_v0  ;;  %1280 = vmatprep.mubr.msk.f32.mxu0 %vm1534_vm0, %v1535_v1  ;;  %v99_v2 = vld [vmem:[%s1989_s6] sm:$0xff]  ;;  %v100_v3 = vld [vmem:[%s1989_s6 + $0x8] sm:$0xff]  ;;  %v101_v4 = vld [vmem:[%s1989_s6 + $0x10] sm:$0xff]  ;;  %s1536_s15 = smov 96   ;;  %v183_v19 = vlaneseq  ;;  %v1537_v26 = vmov 1966171168  }
  0x57   :  { %1319 = vmatprep.subr.bf16.mxu1 %v1533_v0  ;;  %1299 = vmatprep.mubr.msk.f32.mxu1 %vm1534_vm0, %v1535_v1  ;;  %v1314_v5 = vpack.c.bf16 %v100_v3, %v99_v2  ;;  %v102_v6 = vld [vmem:[%s1989_s6 + $0x18] sm:$0xff]  ;;  %v95_v7 = vld [vmem:[#allocation5] sm:$0xff]  ;;  %v228_v8 = vld [vmem:[#allocation8] sm:$0xff]  ;;  %v181_v27 = vunpack.c.l.s4 %v1537_v26  ;;  %vm536_vm2 = vcmask 1041409   ;;  %vm538_vm3 = vcmask 1042434   ;;  %s1242_s11 = sld [smem:[#allocation4 + $0x1]] }
  0x58   :  { %97 = vst.msk [vmem:[#allocation2] sm:$0xff] %vm96_vm1, %v95_v7  ;;  %284 = vrot.lane.b32.xlu0 %v228_v8, %s1536_s15  ;;  %v230_v9 = vld [vmem:[#allocation8 + $0x10] sm:$0xff]  ;;  %v1317_v10 = vpack.c.bf16 %v102_v6, %v101_v4  ;;  %v229_v11 = vld [vmem:[#allocation8 + $0x8] sm:$0xff]  ;;  %v231_v12 = vld [vmem:[#allocation8 + $0x18] sm:$0xff]  ;;  %v1700_v20 = vshrl.u32 %v183_v19, 7  ;;  %vm540_vm4 = vcmask 1043459  }
  0x59   :  { %1315 = vmatpush3.bf16.msra.mxu0 %v1314_v5  ;;  %288 = vrot.lane.b32.xlu1 %v230_v9, %s1536_s15  ;;  %v232_v13 = vld [vmem:[#allocation8 + $0x20] sm:$0xff]  ;;  %v233_v14 = vld [vmem:[#allocation8 + $0x28] sm:$0xff]  ;;  %v234_v16 = vld [vmem:[#allocation8 + $0x30] sm:$0xff]  ;;  %v182_v28 = vunpack.c.0.s8 %v181_v27  ;;  %vm542_vm5 = vcmask 1044484   ;;  %vm544_vm6 = vcmask 1045509   ;;  %vm546_vm7 = vcmask 1046534  }
  0x5a   :  { %1316 = vmatprep.subr.bf16.mxu0 %v1533_v0  ;;  %v235_v17 = vld [vmem:[#allocation8 + $0x38] sm:$0xff]  ;;  %v1241_v18 = vld [vmem:[%s1992_s9] ss:$0 sm:$0xff]  ;;  %v1703_v21 = vsub.s32 0, %v1700_v20  ;;  %v1711_v23 = vsub.s32 1, %v1700_v20  ;;  %vm548_vm8 = vcmask 1047559  }
  0x5b   :  { %v1708_v22 = vld [vmem:[%s1988_s5] sm:$0xff]  ;;  %v185_v31 = vsub.s32 %v182_v28, %v1700_v20  ;;  %s1538_s5 = smov 32   ;;  %v1741_v28 = vsub.s32 3, %v1700_v20  ;;  %vm551_vm9 = vcmask 64512   ;;  %s1243_s14 = sld [smem:[#allocation4 + $0x2]]  ;;  %vm913_vm10 = vcmask 1040384  }
  0x5c   :  { %286 = vrot.lane.b32.xlu0 %v229_v11, %s1536_s15  ;;  %v401_v24 = vrot.slane %v1708_v22, %v1703_v21  ;;  %v408_v25 = vrot.slane %v1708_v22, %v1711_v23  ;;  %s861_s6 = sld [smem:[#allocation4]]  ;;  %s1244_s16 = sld [smem:[#allocation4 + $0x3]]  ;;  %vm915_vm11 = vcmask 1041408   ;;  %vm917_vm12 = vcmask 1042432  }
  0x5d   :  { %1318 = vmatpush3.bf16.msra.mxu0 %v1317_v10  ;;  %290 = vrot.lane.b32.xlu1 %v231_v12, %s1536_s15  ;;  %s866_s17 = scalar_lea.vmem %s1984_s1, %s1242_s11  ;;  %s1245_s20 = sld [smem:[#allocation4 + $0x4]]  ;;  %vm919_vm13 = vcmask 1043456   ;;  %vm921_vm14 = vcmask 1044480   ;;  %vm923_vm15 = vcmask 1045504  }
  0x5e   :  { %1331 = vmatprep.subr.bf16.mxu0 %v1533_v0  ;;  %s1246_s4 = sld [smem:[#allocation4 + $0x5]]  ;;  %s1247_s19 = sld [smem:[#allocation4 + $0x6]] }
  0x5f   :  { %v98_v15 = vld [vmem:[#allocation2] sm:$0xff]  ;;  %s1248_s13 = sld [smem:[#allocation4 + $0x7]] }
  0x60   :  { %1281 = vmatmul.mubr.msk.f32.vlgmr.msra.gmra.mrb[0].mxu0 %vm96_vm1, %v98_v15  ;;  %292 = vrot.lane.b32.xlu0 %v232_v13, %s1536_s15 }
  0x61   :  { %294 = vrot.lane.b32.xlu1 %v233_v14, %s1536_s15  ;;  %1310 = vmatprep.mubr.msk.f32.mxu0 %vm1534_vm0, %v1535_v1  ;;  %s870_s23 = scalar_lea.vmem %s1984_s1, %s1243_s14  ;;  %vm925_vm0 = vcmask 1046528  }
  0x62   :  { %s862_s27 = scalar_lea.vmem %s1984_s1, %s861_s6  ;;  %s874_s7 = scalar_lea.vmem %s1984_s1, %s1244_s16 }
  0x63   :  { %s878_s12 = scalar_lea.vmem %s1984_s1, %s1245_s20 }
  0x64   :  { %296 = vrot.lane.b32.xlu0 %v234_v16, %s1536_s15  ;;  %s882_s0 = scalar_lea.vmem %s1984_s1, %s1246_s4  ;;  %s886_s6 = scalar_lea.vmem %s1984_s1, %s1247_s19 }
  0x65   :  { %298 = vrot.lane.b32.xlu1 %v235_v17, %s1536_s15  ;;  %s890_s2 = scalar_lea.vmem %s1984_s1, %s1248_s13  ;;  %s1541_s1 = smov [#allocation13]  }
  0x68   :  { %329 = vrot.lane.b32.xlu0 %v1241_v18, %s1536_s15 }
  0x69   :  { %410 = vbcast.lane.b32.xlu1 %v408_v25, 256 }
  0x6c   :  { %403 = vbcast.lane.b32.xlu0 %v401_v24, 256  ;;  %v1737_v24 = vsub.s32 2, %v1700_v20 }
  0xca   :  { %v285_v29 = vpop.permute.xlu0 %284 }
  0xcb   :  { %v289_v30 = vpop.permute.xlu1 %288 }
  0xce   :  { %v287_v33 = vpop.permute.xlu0 %286 }
  0xcf   :  { %v291_v39 = vpop.permute.xlu1 %290 }
  0xd2   :  { %v293_v45 = vpop.permute.xlu0 %292 }
  0xd3   :  { %v295_v57 = vpop.permute.xlu1 %294 }
  0xd6   :  { %v297_v63 = vpop.permute.xlu0 %296 }
  0xd7   :  { %v299_v4 = vpop.permute.xlu1 %298 }
  0xda   :  { %v330_v5 = vpop.permute.xlu0 %329 }
 0x133   :  { %v1718_v32 = vpop.f32.mrb[0].mxu0 }
 0x134   :  { %v179_v34 = vcombine.high %v1718_v32, %v1718_v32  ;;  %v186_v35 = vrot.slane %v1718_v32, %v185_v31  ;;  %v1282_v36 = vpop.f32.mrb[1].mxu0 }
 0x136   :  { %v202_v37 = vrot.slane %v186_v35, %v185_v31  ;;  %v194_v38 = vcombine.high %v186_v35, %v186_v35  ;;  %v193_v40 = vrot.slane %v179_v34, %v185_v31  ;;  %v1753_v34 = vsub.s32 5, %v1700_v20 }
 0x138   :  { %v224_v41 = vcombine.high %v202_v37, %v202_v37  ;;  %v239_v42 = vrot.slane %v202_v37, %v1703_v21  ;;  %v216_v43 = vrot.slane %v194_v38, %v185_v31  ;;  %v209_v44 = vrot.slane %v193_v40, %v185_v31  ;;  %v411_v37 = vpop.permute.xlu1 %410  ;;  %v404_v38 = vpop.permute.xlu0 %403 }
 0x139   :  { %v195_v46 = vcombine.high %v193_v40, %v193_v40  ;;  %v436_v36 = vrot.slane %v1708_v22, %v1753_v34 }
 0x13a   :  { %v247_v47 = vrot.slane %v224_v41, %v1703_v21  ;;  %v308_v48 = vadd.f32 %v285_v29, %v239_v42  ;;  %v243_v49 = vrot.slane %v216_v43, %v1703_v21  ;;  %v226_v50 = vcombine.high %v216_v43, %v216_v43 }
 0x13b   :  { %v255_v51 = vrot.slane %v209_v44, %v1703_v21  ;;  %v223_v52 = vrot.slane %v195_v46, %v185_v31  ;;  %v225_v53 = vcombine.high %v209_v44, %v209_v44  ;;  %v415_v29 = vrot.slane %v1708_v22, %v1737_v24 }
 0x13c   :  { %v310_v54 = vadd.f32 %v289_v30, %v247_v47  ;;  %1355 = vtanh.f32 %v308_v48  ;;  %v309_v55 = vadd.f32 %v287_v33, %v243_v49  ;;  %v251_v56 = vrot.slane %v226_v50, %v1703_v21 }
 0x13d   :  { %v259_v58 = vrot.slane %v223_v52, %v1703_v21  ;;  %v227_v59 = vcombine.high %v223_v52, %v223_v52  ;;  %v312_v61 = vadd.f32 %v293_v45, %v255_v51  ;;  %v263_v62 = vrot.slane %v225_v53, %v1703_v21 }
 0x13e   :  { %1357 = vtanh.f32 %v310_v54  ;;  %v311_v60 = vadd.f32 %v291_v39, %v251_v56  ;;  %v1747_v30 = vsub.s32 4, %v1700_v20  ;;  %v422_v33 = vrot.slane %v1708_v22, %v1741_v28 }
 0x13f   :  { %1359 = vtanh.f32 %v309_v55  ;;  %v313_v1 = vadd.f32 %v295_v57, %v259_v58  ;;  %v267_v2 = vrot.slane %v227_v59, %v1703_v21  ;;  %v314_v3 = vadd.f32 %v297_v63, %v263_v62 }
 0x140   :  { %1361 = vtanh.f32 %v311_v60  ;;  %v429_v35 = vrot.slane %v1708_v22, %v1747_v30  ;;  %v1539_v55 = vmov 0   ;;  %v1768_v56 = vsub.s32 6, %v1700_v20 }
 0x141   :  { %1363 = vtanh.f32 %v312_v61  ;;  %v315_v6 = vadd.f32 %v299_v4, %v267_v2  ;;  %1353 = vset.pattern.permute.xlu1 %v1539_v55  ;;  %1354 = vset.pattern.permute.xlu0 %v1539_v55  ;;  %v1773_v58 = vsub.s32 7, %v1700_v20 }
 0x142   :  { %1365 = vtanh.f32 %v313_v1  ;;  %v443_v57 = vrot.slane %v1708_v22, %v1768_v56 }
 0x143   :  { %1367 = vtanh.f32 %v314_v3  ;;  %v450_v59 = vrot.slane %v1708_v22, %v1773_v58 }
 0x144   :  { %1369 = vtanh.f32 %v315_v6 }
 0x146   :  { %v1356_v7 = vpop.eup %1355 }
 0x147   :  { %v332_v8 = vmul.f32 %v1356_v7, %v330_v5 }
 0x148   :  { %v1358_v9 = vpop.eup %1357 }
 0x149   :  { %v1360_v10 = vpop.eup %1359  ;;  %348 = vrot.lane.b32.xlu1 %v332_v8, %s1538_s5  ;;  %v334_v13 = vmul.f32 %v1358_v9, %v330_v5 }
 0x14a   :  { %v333_v11 = vmul.f32 %v1360_v10, %v330_v5  ;;  %v1362_v12 = vpop.eup %1361 }
 0x14b   :  { %v1364_v14 = vpop.eup %1363  ;;  %v335_v15 = vmul.f32 %v1362_v12, %v330_v5 }
 0x14c   :  { %350 = vrot.lane.b32.xlu0 %v333_v11, %s1538_s5  ;;  %v1366_v16 = vpop.eup %1365  ;;  %v336_v17 = vmul.f32 %v1364_v14, %v330_v5 }
 0x14d   :  { %352 = vrot.lane.b32.xlu1 %v334_v13, %s1538_s5  ;;  %v1368_v18 = vpop.eup %1367  ;;  %v337_v25 = vmul.f32 %v1366_v16, %v330_v5 }
 0x14e   :  { %v1370_v26 = vpop.eup %1369  ;;  %v338_v27 = vmul.f32 %v1368_v18, %v330_v5 }
 0x14f   :  { %v339_v31 = vmul.f32 %v1370_v26, %v330_v5 }
 0x150   :  { %354 = vrot.lane.b32.xlu0 %v335_v15, %s1538_s5 }
 0x151   :  { %356 = vrot.lane.b32.xlu1 %v336_v17, %s1538_s5 }
 0x154   :  { %358 = vrot.lane.b32.xlu0 %v337_v25, %s1538_s5  ;;  %v1793_v25 = vand.u32 127, %v183_v19 }
 0x155   :  { %360 = vrot.lane.b32.xlu1 %v338_v27, %s1538_s5 }
 0x158   :  { %362 = vrot.lane.b32.xlu0 %v339_v31, %s1538_s5 }
 0x159   :  { %417 = vbcast.lane.b32.xlu1 %v415_v29, 256  ;;  %v1797_v29 = vsub.s32 %v1793_v25, %v1700_v20 }
 0x15c   :  { %424 = vbcast.lane.b32.xlu0 %v422_v33, 256 }
 0x15d   :  { %431 = vbcast.lane.b32.xlu1 %v429_v35, 256 }
 0x160   :  { %438 = vbcast.lane.b32.xlu0 %v436_v36, 256 }
 0x1bb   :  { %v349_v39 = vpop.permute.xlu1 %348 }
 0x1bc   :  { %v372_v40 = vsel %vm96_vm1, %v349_v39, 0.0 }
 0x1bd   :  { %373 = vadd.xlane.f32.xlu1 %v372_v40 }
 0x1be   :  { %v351_v41 = vpop.permute.xlu0 %350 }
 0x1bf   :  { %v353_v42 = vpop.permute.xlu1 %352  ;;  %v375_v43 = vsel %vm96_vm1, %v351_v41, 0.0 }
 0x1c0   :  { %376 = vadd.xlane.f32.xlu0 %v375_v43  ;;  %v378_v47 = vsel %vm96_vm1, %v353_v42, 0.0 }
 0x1c2   :  { %v355_v44 = vpop.permute.xlu0 %354 }
 0x1c3   :  { %v357_v45 = vpop.permute.xlu1 %356  ;;  %v381_v46 = vsel %vm96_vm1, %v355_v44, 0.0 }
 0x1c4   :  { %382 = vadd.xlane.f32.xlu1 %v381_v46  ;;  %379 = vadd.xlane.f32.xlu0 %v378_v47  ;;  %v384_v50 = vsel %vm96_vm1, %v357_v45, 0.0 }
 0x1c6   :  { %v359_v48 = vpop.permute.xlu0 %358 }
 0x1c7   :  { %v387_v49 = vsel %vm96_vm1, %v359_v48, 0.0  ;;  %v361_v51 = vpop.permute.xlu1 %360 }
 0x1c8   :  { %388 = vadd.xlane.f32.xlu1 %v387_v49  ;;  %385 = vadd.xlane.f32.xlu0 %v384_v50  ;;  %v390_v53 = vsel %vm96_vm1, %v361_v51, 0.0 }
 0x1ca   :  { %v363_v52 = vpop.permute.xlu0 %362 }
 0x1cb   :  { %v393_v54 = vsel %vm96_vm1, %v363_v52, 0.0  ;;  %v418_v60 = vpop.permute.xlu1 %417 }
 0x1cc   :  { %391 = vadd.xlane.f32.xlu0 %v390_v53  ;;  %394 = vadd.xlane.f32.xlu1 %v393_v54 }
 0x1ce   :  { %v425_v61 = vpop.permute.xlu0 %424 }
 0x1cf   :  { %v432_v62 = vpop.permute.xlu1 %431 }
 0x1d2   :  { %v439_v63 = vpop.permute.xlu0 %438 }
 0x1dd   :  { %445 = vbcast.lane.b32.xlu1 %v443_v57, 256 }
 0x1e2   :  { %452 = vbcast.lane.b32.xlu0 %v450_v59, 256 }
 0x24a   :  { %v374_v1 = vpop.xlane.xlu1 %373 }
 0x24b   :  { %v1777_v2 = vadd.f32 %v404_v38, %v374_v1 }
 0x24d   :  { %v377_v3 = vpop.xlane.xlu0 %376  ;;  %479 = vperm.xlu1 %1353, %v1777_v2  }
 0x24e   :  { %v463_v4 = vadd.f32 %v411_v37, %v377_v3 }
 0x250   :  { %482 = vperm.xlu0 %1354, %v463_v4  }
 0x251   :  { %v383_v5 = vpop.xlane.xlu1 %382  ;;  %v380_v6 = vpop.xlane.xlu0 %379 }
 0x252   :  { %v464_v7 = vadd.f32 %v418_v60, %v380_v6  ;;  %v465_v22 = vadd.f32 %v425_v61, %v383_v5 }
 0x254   :  { %485 = vperm.xlu1 %1353, %v464_v7  }
 0x255   :  { %v389_v8 = vpop.xlane.xlu1 %388  ;;  %v386_v9 = vpop.xlane.xlu0 %385 }
 0x256   :  { %v1780_v10 = vadd.f32 %v432_v62, %v386_v9  ;;  %v1783_v13 = vadd.f32 %v439_v63, %v389_v8 }
 0x258   :  { %488 = vperm.xlu1 %1353, %v465_v22   ;;  %491 = vperm.xlu0 %1354, %v1780_v10  }
 0x259   :  { %v395_v11 = vpop.xlane.xlu1 %394  ;;  %v392_v12 = vpop.xlane.xlu0 %391 }
 0x25c   :  { %494 = vperm.xlu1 %1353, %v1783_v13  }
 0x25d   :  { %v446_v14 = vpop.permute.xlu1 %445  ;;  %v453_v15 = vpop.permute.xlu0 %452 }
 0x25e   :  { %v1786_v16 = vadd.f32 %v446_v14, %v392_v12  ;;  %v1788_v17 = vadd.f32 %v453_v15, %v395_v11 }
 0x260   :  { %497 = vperm.xlu0 %1354, %v1786_v16   ;;  %500 = vperm.xlu1 %1353, %v1788_v17  }
 0x2cc   :  { %v480_v18 = vpop.permute.xlu1 %479 }
 0x2cd   :  { %v507_v36 = vrot.slane %v480_v18, %v1797_v29 }
 0x2cf   :  { %v483_v27 = vpop.permute.xlu0 %482 }
 0x2d0   :  { %v511_v31 = vrot.slane %v483_v27, %v1797_v29 }
 0x2d2   :  { %v537_v19 = vsel %vm536_vm2, %v511_v31, %v507_v36 }
 0x2d3   :  { %v486_v26 = vpop.permute.xlu1 %485 }
 0x2d4   :  { %v515_v35 = vrot.slane %v486_v26, %v1797_v29 }
 0x2d6   :  { %v539_v40 = vsel %vm538_vm3, %v515_v35, %v537_v19 }
 0x2d7   :  { %v489_v33 = vpop.permute.xlu1 %488  ;;  %v492_v38 = vpop.permute.xlu0 %491 }
 0x2d8   :  { %v519_v37 = vrot.slane %v489_v33, %v1797_v29  ;;  %v523_v41 = vrot.slane %v492_v38, %v1797_v29 }
 0x2da   :  { %v541_v42 = vsel %vm540_vm4, %v519_v37, %v539_v40 }
 0x2db   :  { %v495_v39 = vpop.permute.xlu1 %494  ;;  %v543_v46 = vsel %vm542_vm5, %v523_v41, %v541_v42 }
 0x2dc   :  { %v527_v43 = vrot.slane %v495_v39, %v1797_v29 }
 0x2de   :  { %v545_v49 = vsel %vm544_vm6, %v527_v43, %v543_v46 }
 0x2df   :  { %v501_v44 = vpop.permute.xlu1 %500  ;;  %v498_v45 = vpop.permute.xlu0 %497 }
 0x2e0   :  { %v535_v47 = vrot.slane %v501_v44, %v1797_v29  ;;  %v531_v48 = vrot.slane %v498_v45, %v1797_v29 }
 0x2e2   :  { %v547_v50 = vsel %vm546_vm7, %v531_v48, %v545_v49 }
 0x2e3   :  { %v549_v51 = vsel %vm548_vm8, %v535_v47, %v547_v50 }
 0x2e4   :  { %v552_v52 = vsel %vm551_vm9, %v549_v51, -inf }
 0x2e5   :  { %553 = vmax.xlane.f32.xlu0 %v552_v52 }
 0x372   :  { %v554_v53 = vpop.xlane.xlu0 %553 }
 0x373   :  { %v559_v54 = vrot.slane %v554_v53, %v1703_v21  ;;  %v563_v55 = vrot.slane %v554_v53, %v1711_v23  ;;  %v567_v57 = vrot.slane %v554_v53, %v1737_v24  ;;  %v571_v62 = vrot.slane %v554_v53, %v1741_v28 }
 0x374   :  { %v575_v3 = vrot.slane %v554_v53, %v1747_v30  ;;  %v579_v8 = vrot.slane %v554_v53, %v1753_v34 }
 0x375   :  { %v596_v59 = vsub.f32 %v1777_v2, %v559_v54  ;;  %v597_v60 = vsub.f32 %v463_v4, %v563_v55  ;;  %v598_v63 = vsub.f32 %v464_v7, %v567_v57  ;;  %v599_v5 = vsub.f32 %v465_v22, %v571_v62 }
 0x376   :  { %v600_v9 = vsub.f32 %v1780_v10, %v575_v3  ;;  %v583_v2 = vrot.slane %v554_v53, %v1768_v56  ;;  %v601_v4 = vsub.f32 %v1783_v13, %v579_v8  ;;  %v587_v22 = vrot.slane %v554_v53, %v1773_v58 }
 0x377   :  { %v604_v61 = vmul.f32 1.442695, %v596_v59  ;;  %v606_v1 = vmul.f32 1.442695, %v597_v60  ;;  %v608_v6 = vmul.f32 1.442695, %v598_v63 }
 0x378   :  { %v610_v11 = vmul.f32 1.442695, %v599_v5  ;;  %v612_v7 = vmul.f32 1.442695, %v600_v9  ;;  %v602_v15 = vsub.f32 %v1786_v16, %v583_v2  ;;  %v614_v10 = vmul.f32 1.442695, %v601_v4 }
 0x379   :  { %1371 = vpow2.f32 %v604_v61  ;;  %v603_v26 = vsub.f32 %v1788_v17, %v587_v22 }
 0x37a   :  { %1373 = vpow2.f32 %v606_v1  ;;  %v616_v27 = vmul.f32 1.442695, %v602_v15 }
 0x37b   :  { %1375 = vpow2.f32 %v608_v6  ;;  %v618_v13 = vmul.f32 1.442695, %v603_v26  ;;  %v949_v26 = vld [vmem:[#allocation10 + $0x8] sm:$0xff] }
 0x37c   :  { %1377 = vpow2.f32 %v610_v11 }
 0x37d   :  { %1379 = vpow2.f32 %v612_v7 }
 0x37e   :  { %1381 = vpow2.f32 %v614_v10 }
 0x37f   :  { %1383 = vpow2.f32 %v616_v27 }
 0x380   :  { %1385 = vpow2.f32 %v618_v13  ;;  %v952_v13 = vld [vmem:[#allocation10 + $0x20] sm:$0xff] }
 0x383   :  { %v1823_v12 = vpop.eup %1371 }
 0x384   :  { %629 = vperm.xlu1 %1353, %v1823_v12   ;;  %v1374_v14 = vpop.eup %1373 }
 0x385   :  { %v1376_v18 = vpop.eup %1375 }
 0x386   :  { %v1378_v31 = vpop.eup %1377 }
 0x387   :  { %v1380_v33 = vpop.eup %1379 }
 0x388   :  { %632 = vperm.xlu1 %1353, %v1374_v14   ;;  %v1382_v35 = vpop.eup %1381 }
 0x389   :  { %v1384_v36 = vpop.eup %1383 }
 0x38a   :  { %v1386_v16 = vpop.eup %1385 }
 0x38c   :  { %635 = vperm.xlu1 %1353, %v1376_v18  }
 0x390   :  { %638 = vperm.xlu1 %1353, %v1378_v31  }
 0x394   :  { %641 = vperm.xlu1 %1353, %v1380_v33  }
 0x398   :  { %644 = vperm.xlu1 %1353, %v1382_v35  }
 0x39c   :  { %647 = vperm.xlu1 %1353, %v1384_v36  }
 0x3a0   :  { %650 = vperm.xlu1 %1353, %v1386_v16  }
 0x403   :  { %v630_v37 = vpop.permute.xlu1 %629 }
 0x404   :  { %v655_v43 = vrot.slane %v630_v37, %v1797_v29  ;;  %v1169_v37 = vadd.s32 4294967232, %v1793_v25 }
 0x407   :  { %v633_v38 = vpop.permute.xlu1 %632 }
 0x408   :  { %v659_v41 = vrot.slane %v633_v38, %v1797_v29  ;;  %v1865_v38 = vsub.s32 %v1169_v37, %v1700_v20  ;;  %v750_v20 = vld [vmem:[%s1986_s3 + $0x10] sm:$0xff]  ;;  %v755_v37 = vld [vmem:[%s1986_s3 + $0x38] sm:$0xff] }
 0x40a   :  { %v684_v47 = vsel %vm536_vm2, %v659_v41, %v655_v43 }
 0x40b   :  { %v636_v19 = vpop.permute.xlu1 %635 }
 0x40c   :  { %v663_v42 = vrot.slane %v636_v19, %v1797_v29  ;;  %v749_v19 = vld [vmem:[%s1986_s3 + $0x8] sm:$0xff] }
 0x40e   :  { %v685_v49 = vsel %vm538_vm3, %v663_v42, %v684_v47 }
 0x40f   :  { %v639_v39 = vpop.permute.xlu1 %638 }
 0x410   :  { %v667_v44 = vrot.slane %v639_v39, %v1797_v29 }
 0x412   :  { %v686_v51 = vsel %vm540_vm4, %v667_v44, %v685_v49  ;;  %v751_v49 = vld [vmem:[%s1986_s3 + $0x18] sm:$0xff] }
 0x413   :  { %v642_v17 = vpop.permute.xlu1 %641 }
 0x414   :  { %v671_v45 = vrot.slane %v642_v17, %v1797_v29  ;;  %v748_v17 = vld [vmem:[%s1986_s3] sm:$0xff] }
 0x416   :  { %v687_v52 = vsel %vm542_vm5, %v671_v45, %v686_v51 }
 0x417   :  { %v645_v40 = vpop.permute.xlu1 %644 }
 0x418   :  { %v675_v48 = vrot.slane %v645_v40, %v1797_v29 }
 0x41a   :  { %v688_v54 = vsel %vm544_vm6, %v675_v48, %v687_v52 }
 0x41b   :  { %v648_v46 = vpop.permute.xlu1 %647 }
 0x41c   :  { %v679_v50 = vrot.slane %v648_v46, %v1797_v29 }
 0x41e   :  { %v689_v57 = vsel %vm546_vm7, %v679_v50, %v688_v54 }
 0x41f   :  { %v651_v53 = vpop.permute.xlu1 %650 }
 0x420   :  { %v683_v55 = vrot.slane %v651_v53, %v1797_v29 }
 0x422   :  { %v690_v59 = vsel %vm548_vm8, %v683_v55, %v689_v57 }
 0x423   :  { %v692_v60 = vsel %vm551_vm9, %v690_v59, 0.0 }
 0x424   :  { %693 = vadd.xlane.f32.xlu0 %v692_v60  ;;  %v752_v60 = vld [vmem:[%s1986_s3 + $0x20] sm:$0xff] }
 0x4b1   :  { %v694_v61 = vpop.xlane.xlu0 %693 }
 0x4b2   :  { %1387 = vrcp.f32 %v694_v61 }
 0x4bc   :  { %v1388_v62 = vpop.eup %1387 }
 0x4bd   :  { %v696_v63 = vmul.f32 %v1388_v62, %v694_v61 }
 0x4bf   :  { %v697_v1 = vsub.f32 2.0, %v696_v63 }
 0x4c1   :  { %v698_v3 = vmul.f32 %v1388_v62, %v697_v1 }
 0x4c3   :  { %v707_v5 = vrot.slane %v698_v3, %v1711_v23  ;;  %v703_v6 = vrot.slane %v698_v3, %v1703_v21  ;;  %v711_v9 = vrot.slane %v698_v3, %v1737_v24  ;;  %v715_v2 = vrot.slane %v698_v3, %v1741_v28  ;;  %v1251_v28 = vld [vmem:[%s1992_s9 + $0x1] ss:$0 sm:$0xff] }
 0x4c4   :  { %v719_v7 = vrot.slane %v698_v3, %v1747_v30  ;;  %v723_v15 = vrot.slane %v698_v3, %v1753_v34  ;;  %v731_v24 = vrot.slane %v698_v3, %v1773_v58  ;;  %v948_v30 = vld [vmem:[#allocation10] sm:$0xff]  ;;  %v950_v34 = vld [vmem:[#allocation10 + $0x10] sm:$0xff]  ;;  %v953_v58 = vld [vmem:[#allocation10 + $0x28] sm:$0xff] }
 0x4c5   :  { %v741_v8 = vmul.f32 %v1374_v14, %v707_v5  ;;  %v740_v29 = vmul.f32 %v1823_v12, %v703_v6  ;;  %v742_v11 = vmul.f32 %v1376_v18, %v711_v9  ;;  %v743_v4 = vmul.f32 %v1378_v31, %v715_v2  ;;  %v951_v31 = vld [vmem:[#allocation10 + $0x18] sm:$0xff] }
 0x4c6   :  { %v744_v22 = vmul.f32 %v1380_v33, %v719_v7  ;;  %v745_v10 = vmul.f32 %v1382_v35, %v723_v15  ;;  %v727_v14 = vrot.slane %v698_v3, %v1768_v56  ;;  %v747_v18 = vmul.f32 %v1386_v16, %v731_v24  ;;  %v954_v35 = vld [vmem:[#allocation10 + $0x30] sm:$0xff]  ;;  %v753_v9 = vld [vmem:[%s1986_s3 + $0x28] sm:$0xff] }
 0x4c7   :  { %763 = vperm.xlu0 %1354, %v741_v8   ;;  %758 = vperm.xlu1 %1353, %v740_v29   ;;  %v1320_v27 = vpack.c.bf16 %v949_v26, %v948_v30  ;;  %v1323_v56 = vpack.c.bf16 %v951_v31, %v950_v34  ;;  %v1326_v33 = vpack.c.bf16 %v953_v58, %v952_v13 }
 0x4c8   :  { %v746_v12 = vmul.f32 %v1384_v36, %v727_v14  ;;  %v955_v36 = vld [vmem:[#allocation10 + $0x38] sm:$0xff] }
 0x4c9   :  { %1321 = vmatpush3.bf16.msra.mxu1 %v1320_v27  ;;  %v1329_v16 = vpack.c.bf16 %v955_v36, %v954_v35 }
 0x4ca   :  { %1322 = vmatprep.subr.bf16.mxu1 %v1533_v0 }
 0x4cb   :  { %768 = vperm.xlu1 %1353, %v742_v11  }
 0x4cd   :  { %1324 = vmatpush3.bf16.msra.mxu1 %v1323_v56 }
 0x4ce   :  { %1325 = vmatprep.subr.bf16.mxu1 %v1533_v0 }
 0x4cf   :  { %773 = vperm.xlu1 %1353, %v743_v4  }
 0x4d1   :  { %1327 = vmatpush3.bf16.msra.mxu1 %v1326_v33 }
 0x4d2   :  { %1328 = vmatprep.subr.bf16.mxu1 %v1533_v0 }
 0x4d3   :  { %778 = vperm.xlu1 %1353, %v744_v22  }
 0x4d5   :  { %1330 = vmatpush3.bf16.msra.mxu1 %v1329_v16 }
 0x4d7   :  { %783 = vperm.xlu1 %1353, %v745_v10  }
 0x4db   :  { %788 = vperm.xlu1 %1353, %v746_v12  }
 0x4df   :  { %793 = vperm.xlu1 %1353, %v747_v18  }
 0x4e3   :  { %1058 = vrot.lane.b32.xlu1 %v1251_v28, %s1538_s5  ;;  %v754_v28 = vld [vmem:[%s1986_s3 + $0x30] sm:$0xff] }
 0x546   :  { %v764_v39 = vpop.permute.xlu0 %763  ;;  %v759_v40 = vpop.permute.xlu1 %758 }
 0x547   :  { %v797_v41 = vmul.f32 %v764_v39, %v749_v19  ;;  %v1177_v42 = vrot.slane %v764_v39, %v1865_v38  ;;  %v1173_v43 = vrot.slane %v759_v40, %v1865_v38  ;;  %v796_v25 = vmul.f32 %v759_v40, %v748_v17 }
 0x549   :  { %v811_v47 = vsel %vm96_vm1, %v797_v41, 0.0  ;;  %v1202_v48 = vsel %vm536_vm2, %v1177_v42, %v1173_v43  ;;  %v804_v50 = vsel %vm96_vm1, %v796_v25, 0.0 }
 0x54a   :  { %v769_v44 = vpop.permute.xlu1 %768  ;;  %v812_v54 = vrot.slane %v811_v47, 4  ;;  %v805_v59 = vrot.slane %v804_v50, 4 }
 0x54b   :  { %v798_v45 = vmul.f32 %v769_v44, %v750_v20  ;;  %v1181_v46 = vrot.slane %v769_v44, %v1865_v38 }
 0x54c   :  { %v813_v5 = vadd.f32 %v812_v54, %v811_v47  ;;  %v806_v29 = vadd.f32 %v805_v59, %v804_v50 }
 0x54d   :  { %v1203_v51 = vsel %vm538_vm3, %v1181_v46, %v1202_v48  ;;  %v818_v52 = vsel %vm96_vm1, %v798_v45, 0.0 }
 0x54e   :  { %v774_v53 = vpop.permute.xlu1 %773  ;;  %v819_v61 = vrot.slane %v818_v52, 4  ;;  %v814_v10 = vrot.slane %v813_v5, 2  ;;  %v807_v24 = vrot.slane %v806_v29, 2 }
 0x54f   :  { %v799_v55 = vmul.f32 %v774_v53, %v751_v49  ;;  %v1185_v57 = vrot.slane %v774_v53, %v1865_v38 }
 0x550   :  { %v820_v11 = vadd.f32 %v819_v61, %v818_v52  ;;  %v815_v13 = vadd.f32 %v814_v10, %v813_v5  ;;  %v808_v36 = vadd.f32 %v807_v24, %v806_v29 }
 0x551   :  { %v825_v62 = vsel %vm96_vm1, %v799_v55, 0.0  ;;  %v1204_v63 = vsel %vm540_vm4, %v1185_v57, %v1203_v51 }
 0x552   :  { %v826_v1 = vrot.slane %v825_v62, 4  ;;  %v779_v3 = vpop.permute.xlu1 %778  ;;  %v821_v30 = vrot.slane %v820_v11, 2  ;;  %v816_v20 = vrot.slane %v815_v13, 1  ;;  %v809_v46 = vrot.slane %v808_v36, 1 }
 0x553   :  { %v800_v6 = vmul.f32 %v779_v3, %v752_v60  ;;  %v1189_v8 = vrot.slane %v779_v3, %v1865_v38 }
 0x554   :  { %v827_v7 = vadd.f32 %v826_v1, %v825_v62  ;;  %v822_v19 = vadd.f32 %v821_v30, %v820_v11  ;;  %v817_v55 = vadd.f32 %v816_v20, %v815_v13  ;;  %v810_v59 = vadd.f32 %v809_v46, %v808_v36  ;;  %v867_v30 = vld [vmem:[%s866_s17] sm:$0x1] }
 0x555   :  { %v832_v2 = vsel %vm96_vm1, %v800_v6, 0.0  ;;  %v1205_v4 = vsel %vm542_vm5, %v1189_v8, %v1204_v63  ;;  %v879_v13 = vld [vmem:[%s878_s12] sm:$0x1] }
 0x556   :  { %v833_v22 = vrot.slane %v832_v2, 4  ;;  %v784_v15 = vpop.permute.xlu1 %783  ;;  %v828_v27 = vrot.slane %v827_v7, 2  ;;  %v823_v49 = vrot.slane %v822_v19, 1  ;;  %v935_v6 = vsel %vm536_vm2, %v817_v55, %v810_v59 }
 0x557   :  { %v801_v14 = vmul.f32 %v784_v15, %v753_v9  ;;  %v1193_v12 = vrot.slane %v784_v15, %v1865_v38  ;;  %v946_v9 = vld [vmem:[%s1992_s9] sm:$0x3]  ;;  %s1540_s9 = smov 64   ;;  %v902_v36 = vrot.slane %v879_v13, 4  ;;  %vm972_vm2 = vcmask 523264  }
 0x558   :  { %v834_v18 = vadd.f32 %v833_v22, %v832_v2  ;;  %v829_v40 = vadd.f32 %v828_v27, %v827_v7  ;;  %v824_v63 = vadd.f32 %v823_v49, %v822_v19  ;;  %v875_v27 = vld [vmem:[%s874_s7] sm:$0x1] }
 0x559   :  { %v839_v26 = vsel %vm96_vm1, %v801_v14, 0.0  ;;  %v1206_v34 = vsel %vm544_vm6, %v1193_v12, %v1205_v4  ;;  %v964_v4 = vrot.slane %v946_v9, %v1711_v23 }
 0x55a   :  { %v840_v31 = vrot.slane %v839_v26, 4  ;;  %v789_v56 = vpop.permute.xlu1 %788  ;;  %v835_v58 = vrot.slane %v834_v18, 2  ;;  %v830_v52 = vrot.slane %v829_v40, 1  ;;  %v936_v2 = vsel %vm538_vm3, %v824_v63, %v935_v6 }
 0x55b   :  { %v802_v33 = vmul.f32 %v789_v56, %v754_v28  ;;  %v1197_v35 = vrot.slane %v789_v56, %v1865_v38  ;;  %967 = vrot.lane.b32.xlu1 %v964_v4, %s1536_s15  ;;  %vm969_vm3 = vcmask 785408  }
 0x55c   :  { %v841_v16 = vadd.f32 %v840_v31, %v839_v26  ;;  %v836_v25 = vadd.f32 %v835_v58, %v834_v18  ;;  %v960_v18 = vrot.slane %v946_v9, %v1703_v21  ;;  %v871_v21 = vld [vmem:[%s870_s23] sm:$0x1]  ;;  %v893_v26 = vrot.slane %v867_v30, 7 }
 0x55d   :  { %v846_v39 = vsel %vm96_vm1, %v802_v33, 0.0  ;;  %v1207_v17 = vsel %vm546_vm7, %v1197_v35, %v1206_v34  ;;  %v863_v34 = vld [vmem:[%s862_s27] sm:$0x1]  ;;  %v896_v31 = vrot.slane %v871_v21, 6  ;;  %v899_v58 = vrot.slane %v875_v27, 5 }
 0x55e   :  { %v842_v41 = vrot.slane %v841_v16, 2  ;;  %v847_v42 = vrot.slane %v846_v39, 4  ;;  %v794_v43 = vpop.permute.xlu1 %793  ;;  %v837_v57 = vrot.slane %v836_v25, 1  ;;  %v914_v56 = vsel %vm913_vm10, %v863_v34, %v893_v26  ;;  %v883_v35 = vld [vmem:[%s882_s0] sm:$0x1] }
 0x55f   :  { %v803_v44 = vmul.f32 %v794_v43, %v755_v37  ;;  %v1201_v45 = vrot.slane %v794_v43, %v1865_v38  ;;  %v831_v38 = vadd.f32 %v830_v52, %v829_v40  ;;  %v916_v33 = vsel %vm915_vm11, %v914_v56, %v896_v31  ;;  %v887_v37 = vld [vmem:[%s886_s6] sm:$0x1] }
 0x560   :  { %v843_v47 = vadd.f32 %v842_v41, %v841_v16  ;;  %v848_v48 = vadd.f32 %v847_v42, %v846_v39  ;;  %v838_v5 = vadd.f32 %v837_v57, %v836_v25  ;;  %v918_v16 = vsel %vm917_vm12, %v916_v33, %v899_v58 }
 0x561   :  { %v853_v50 = vsel %vm96_vm1, %v803_v44, 0.0  ;;  %v1914_v51 = vsel %vm548_vm8, %v1201_v45, %v1207_v17  ;;  %v937_v22 = vsel %vm540_vm4, %v831_v38, %v936_v2  ;;  %v905_v19 = vrot.slane %v883_v35, 3  ;;  %v891_v17 = vld [vmem:[%s890_s2] sm:$0x1]  ;;  %v1089_v38 = vld [vmem:[#allocation11] sm:$0xff] }
 0x562   :  { %v849_v53 = vrot.slane %v848_v48, 2  ;;  %v854_v54 = vrot.slane %v853_v50, 4  ;;  %v844_v60 = vrot.slane %v843_v47, 1  ;;  %v938_v15 = vsel %vm542_vm5, %v838_v5, %v937_v22  ;;  %v1059_v28 = vpop.permute.xlu1 %1058  ;;  %v1092_v5 = vld [vmem:[#allocation11 + $0x18] sm:$0xff] }
 0x563   :  { %v1061_v23 = vadd.f32 %v1059_v28, %v1718_v32  ;;  %v920_v39 = vsel %vm919_vm13, %v918_v16, %v902_v36  ;;  %v908_v40 = vrot.slane %v887_v37, 2  ;;  %v911_v42 = vrot.slane %v891_v17, 1 }
 0x564   :  { %v850_v61 = vadd.f32 %v849_v53, %v848_v48  ;;  %v855_v62 = vadd.f32 %v854_v54, %v853_v50  ;;  %v845_v8 = vadd.f32 %v844_v60, %v843_v47  ;;  %v922_v41 = vsel %vm921_vm14, %v920_v39, %v905_v19 }
 0x565   :  { %v924_v43 = vsel %vm923_vm15, %v922_v41, %v908_v40  ;;  %vm1212_vm4 = vcmask 588800  }
 0x566   :  { %v851_v1 = vrot.slane %v850_v61, 1  ;;  %v856_v3 = vrot.slane %v855_v62, 2  ;;  %v939_v14 = vsel %vm544_vm6, %v845_v8, %v938_v15  ;;  %v926_v20 = vsel %vm925_vm0, %v924_v43, %v911_v42 }
 0x568   :  { %v857_v29 = vadd.f32 %v856_v3, %v855_v62  ;;  %v852_v11 = vadd.f32 %v851_v1, %v850_v61  ;;  %v1395_v61 = vld [vmem:[#allocation2] sm:$0xff] }
 0x569   :  { %v1091_v1 = vld [vmem:[#allocation11 + $0x10] sm:$0xff] }
 0x56a   :  { %v858_v7 = vrot.slane %v857_v29, 1  ;;  %v940_v12 = vsel %vm546_vm7, %v852_v11, %v939_v14  ;;  %v1335_v6 = vpack.c.bf16 %v1092_v5, %v1091_v1 }
 0x56c   :  { %v859_v10 = vadd.f32 %v858_v7, %v857_v29 }
 0x56e   :  { %v941_v24 = vsel %vm548_vm8, %v859_v10, %v940_v12 }
 0x56f   :  { %942 = vrot.lane.b32.xlu0 %v941_v24, %s1538_s5 }
 0x573   :  { %965 = vrot.lane.b32.xlu0 %v960_v18, %s1536_s15 }
 0x577   :  { %1063 = vrot.lane.b32.xlu0 %v1061_v23, %s1540_s9 }
 0x5cd   :  { %v968_v45 = vpop.permute.xlu1 %967 }
 0x5e1   :  { %v943_v25 = vpop.permute.xlu0 %942 }
 0x5e2   :  { %v945_v44 = vsel %vm96_vm1, %v926_v20, %v943_v25 }
 0x5e3   :  { %1300 = vmatmul.mubr.msk.f32.vlgmr.msra.gmra.mrb[0].mxu1 %vm972_vm2, %v945_v44 }
 0x5e5   :  { %v966_v46 = vpop.permute.xlu0 %965 }
 0x5e6   :  { %v970_v47 = vsel %vm969_vm3, %v966_v46, %v968_v45 }
 0x5e9   :  { %v1064_v59 = vpop.permute.xlu0 %1063 }
 0x6b6   :  { %v1042_v48 = vpop.f32.mrb[0].mxu1 }
 0x6b7   :  { %v1043_v49 = vadd.f32 %v1042_v48, %v970_v47  ;;  %v1301_v50 = vpop.f32.mrb[1].mxu1 }
 0x6b9   :  { %v1046_v52 = vadd.f32 %v1043_v49, %v1718_v32  ;;  %v1090_v32 = vld [vmem:[#allocation11 + $0x8] sm:$0xff] }
 0x6ba   :  { %v1332_v3 = vpack.c.bf16 %v1090_v32, %v1089_v38 }
 0x6bb   :  { %v1250_v53 = vmul.f32 -1.442695, %v1046_v52 }
 0x6bc   :  { %1333 = vmatpush3.bf16.msra.mxu0 %v1332_v3 }
 0x6bd   :  { %1389 = vpow2.f32 %v1250_v53  ;;  %1334 = vmatprep.subr.bf16.mxu0 %v1533_v0 }
 0x6c0   :  { %1336 = vmatpush3.bf16.msra.mxu0 %v1335_v6 }
 0x6c7   :  { %v1390_v54 = vpop.eup %1389 }
 0x6c8   :  { %v1050_v55 = vadd.f32 1.0, %v1390_v54 }
 0x6ca   :  { %1391 = vrcp.f32 %v1050_v55 }
 0x6d4   :  { %v1392_v57 = vpop.eup %1391 }
 0x6d5   :  { %v1066_v60 = vmul.f32 %v1392_v57, %v1064_v59  ;;  %v1073_v9 = vsub.f32 1.0, %v1392_v57 }
 0x6d7   :  { %1068 = vrot.lane.b32.xlu1 %v1066_v60, %s1540_s9 }
 0x6db   :  { %1079 = vrot.lane.b32.xlu1 %v1395_v61, %s1538_s5 }
 0x6df   :  { %1094 = vrot.lane.b32.xlu1 %v1043_v49, %s1538_s5  ;;  %s1221_s5 = sshll.u32 %s1541_s1, 4  ;;  %s1222_s5 = int_to_ptr.vmem [resolvable:$true] %s1221_s5 }
 0x6e0   :  { %p1499_p8 = scmp.lt.s32.totalorder %s1222_s5, %s1222_s5 }
 0x749   :  { %v1069_v62 = vpop.permute.xlu1 %1068 }
 0x74a   :  { %v1071_v63 = vadd.f32 %v1069_v62, %v1043_v49 }
 0x74c   :  { %1393 = vtanh.f32 %v1071_v63 }
 0x74d   :  { %v1080_v29 = vpop.permute.xlu1 %1079 }
 0x74e   :  { %v1082_v2 = vmul.f32 %v1392_v57, %v1080_v29 }
 0x751   :  { %v1095_v15 = vpop.permute.xlu1 %1094 }
 0x756   :  { %v1394_v8 = vpop.eup %1393 }
 0x757   :  { %1075 = vrot.lane.b32.xlu0 %v1394_v8, %s1536_s15 }
 0x7c9   :  { %v1076_v11 = vpop.permute.xlu0 %1075 }
 0x7ca   :  { %v1078_v4 = vmul.f32 %v1076_v11, %v1073_v9 }
 0x7cc   :  { %v1083_v7 = vadd.f32 %v1082_v2, %v1078_v4 }
 0x7ce   :  { %1085 = vrot.lane.b32.xlu0 %v1083_v7, %s1536_s15  ;;  %s1494_s15 = scalar_lea.vmem %s1222_s5, 128 }
 0x7cf   :  { %p1495_p7 = scmp.ne.s32.totalorder %s1222_s5, %s1494_s15  ;;  %p1500_p9 = scmp.lt.s32.totalorder %s1494_s15, %s1494_s15 }
 0x7d1   :  { %p1501_p10 = por %p1500_p9, %p1499_p8 }
 0x7d3   :  { %p1502_p11 = pnand %p1501_p10, %p1495_p7 }
 0x840   :  { %v1086_v22 = vpop.permute.xlu0 %1085 }
 0x841   :  { %1088 = vst.msk [vmem:[#allocation2] sm:$0xff] %vm96_vm1, %v1086_v22  ;;  %1311 = vmatmul.mubr.msk.f32.vlgmr.msra.gmra.mrb[2].mxu0 %vm96_vm1, %v1086_v22 }
 0x914   :  { %v1165_v10 = vpop.f32.mrb[2].mxu0 }
 0x915   :  { %v1166_v0 = vadd.f32 %v1165_v10, %v1095_v15  ;;  %v1312_v14 = vpop.f32.mrb[3].mxu0 }
 0x917   :  { %v1210_v12 = vsel %vm96_vm1, %v1166_v0, %v1083_v7 }
 0x918   :  { %v1211_v24 = vsel %vm972_vm2, %v1210_v12, %v1914_v51 }
 0x919   :  { %v1213_v18 = vsel %vm1212_vm4, %v1211_v24, 0.0 }
 0x91a   :  { %1214 = vst [vmem:[#allocation13] sm:$0xff] %v1213_v18 }
 0x91b   :  { %1505 = shalt.err (!%p1502_p11)
}
 0x91c   :  { %s1506_s20 = scalar_lea.hbm %s1993_s10, 128 }
 0x91d   :  { %p1507_p12 = scmp.ne.s32.totalorder %s1993_s10, %s1506_s20  ;;  %p1510_p13 = scmp.lt.u32.totalorder %s1506_s20, %s1993_s10 }
 0x91f   :  { %p1512_p0 = pnand %p1510_p13, %p1507_p12 }
 0x921   :  { %1515 = shalt.err (!%p1512_p0)
}
 0x922   :  { %1224 = dma.vmem_to_hbm [thread:$0]  %s1222_s5, 128, %s1993_s10, [#allocation7]  }
 0x923   :  { %1524 = dma.done.wait [#allocation7], 128  }
 0x924   :  { %1525 = vsyncadd [#allocation7], 4294967168 }
 0x925   :  { %1228 = vsyncpa [#allocation6], 1 }
 0x926   :  { %1229 = vsyncpa [#allocation9], 1 }
 0x927   :  { %1230 = vsyncpa [#allocation12], 1 }
 0x928   :  { %1231 = vsyncpa [#allocation7], 1 }

</bundles_post_ra>
